<compile_context>
chip_gen: v5e
topology: v5e:2x2
jax: 0.10.0
libtpu: 0.0.40
codegen_flags: <defaults>
</compile_context>

<pallas_src>
import math
from functools import partial

import jax
import jax.numpy as jnp
from jax.experimental import pallas as pl
from jax.experimental.pallas import tpu as pltpu


def _round_up(x, m):
    return ((x + m - 1) // m) * m


def _mlp_kernel(x_ref, *refs):
    """Fused MLP forward for one batch tile (batch in lanes).

    refs = (w0, b0, w1, b1, ..., w_last, b_last, out_ref)
      x_ref   : [in_dim, TB]        (in_dim tiny, =2)
      w0      : [H0p, in_dim]       (PyTorch [out, in], out padded to 128k)
      b0      : [H0p, 1]
      wi      : [Hip, H(i-1)p]      (PyTorch layout, both dims padded)
      bi      : [Hip, 1]
      w_last  : [out_dim, Hlastp]   (PyTorch layout, in-dim padded)
      b_last  : [out_dim, 1]
      out_ref : [out_dim, TB]       (lane-dense output tile)
    """
    out_ref = refs[-1]
    prefs = refs[:-1]
    n_layers = len(prefs) // 2
    assert n_layers >= 2, "kernel expects >=1 hidden Linear + output Linear"

    x = x_ref[...]                                 # (in_dim, TB) f32

    # --- layer 0 on the VPU: K=2 matmul replaced by broadcast FMAs ---
    w0 = prefs[0][...]                             # (H0p, in_dim)
    b0 = prefs[1][...]                             # (H0p, 1)
    h = b0 + w0[:, 0:1] * x[0:1, :]                # (H0p, TB)
    for c in range(1, x_ref.shape[0]):
        h = h + w0[:, c:c + 1] * x[c:c + 1, :]
    h = jnp.maximum(h, 0.0)

    # --- middle hidden layers on the MXU (NN matmuls, no transposes) ---
    for li in range(1, n_layers - 1):
        w = prefs[2 * li][...]                     # (Hip, H(i-1)p)
        b = prefs[2 * li + 1][...]                 # (Hip, 1)
        h = jnp.dot(w, h, preferred_element_type=jnp.float32) + b
        h = jnp.maximum(h, 0.0)

    # --- final layer: already emitted lane-dense along the batch dim ---
    w_last = prefs[2 * (n_layers - 1)][...]        # (out_dim, Hlastp)
    b_last = prefs[2 * (n_layers - 1) + 1][...]    # (out_dim, 1)
    y = jnp.dot(w_last, h, preferred_element_type=jnp.float32) + b_last
    out_ref[...] = y.astype(out_ref.dtype)         # (out_dim, TB)


def pack_params(params):
    """PyTorch-layout params [(weight [out,in], bias [out]), ...] ->
    kernel layout (see _mlp_kernel docstring), hidden widths padded to 128.

    Padding is bit-exact: padded rows get zero weight + zero bias, ReLU(0)=0,
    and the padded columns of the next layer multiply those zero rows.
    Call this ONCE (outside the per-step path) and reuse the result."""
    n = len(params)
    assert n >= 2, "BaarleNet always has >=1 hidden layer + the output Linear"
    packed = []
    for i, (w, b) in enumerate(params):
        w = jnp.asarray(w, jnp.float32)
        b = jnp.asarray(b, jnp.float32)
        out_f, in_f = w.shape
        if i == 0:                                       # first Linear (in=2)
            out_p = _round_up(out_f, 128)
            wp = jnp.zeros((out_p, in_f), jnp.float32).at[:out_f, :].set(w)
            bp = jnp.zeros((out_p, 1), jnp.float32).at[:out_f, 0].set(b)
        elif i == n - 1:                                 # final Linear (out=2)
            in_p = _round_up(in_f, 128)
            wp = jnp.zeros((out_f, in_p), jnp.float32).at[:, :in_f].set(w)
            bp = b.reshape(out_f, 1)
        else:                                            # hidden Linear
            in_p = _round_up(in_f, 128)
            out_p = _round_up(out_f, 128)
            wp = jnp.zeros((out_p, in_p), jnp.float32).at[:out_f, :in_f].set(w)
            bp = jnp.zeros((out_p, 1), jnp.float32).at[:out_f, 0].set(b)
        packed += [wp, bp]
    return tuple(packed)


@partial(jax.jit, static_argnames=("block_b",))
def _forward_impl(x, packed, *, block_b):
    x = jnp.asarray(x, jnp.float32)
    batch, in_dim = x.shape
    out_dim = packed[-1].shape[0]

    # Batch tile: multiple of 128 (lane-dense), capped at block_b, and split
    # into >=2 tiles when the batch allows so v7x megacore gets both TCs busy
    # (costs at most one extra ~0.35us step on single-TC v5e/v6e).
    tb_cap = _round_up(block_b, 128)
    b128 = _round_up(batch, 128)
    if b128 >= 256:
        tb = min(tb_cap, _round_up(-(-b128 // 2), 128))
    else:
        tb = min(tb_cap, b128)
    b_pad = _round_up(batch, tb)
    grid = (b_pad // tb,)

    # Batch-in-lanes: kernel input is [in_dim, B_pad] (lane-dense blocks).
    x_t = jnp.pad(jnp.transpose(x), ((0, 0), (0, b_pad - batch)))

    in_specs = [pl.BlockSpec((in_dim, tb), lambda i: (0, i))]
    for p in packed:
        # full-array block, VMEM-resident across all batch tiles
        in_specs.append(pl.BlockSpec(p.shape, lambda i: (0, 0)))
    out_specs = pl.BlockSpec((out_dim, tb), lambda i: (0, i))

    flops = 2 * b_pad * sum(int(w.shape[0] * w.shape[1]) for w in packed[0::2])
    bytes_accessed = 4 * (in_dim * b_pad + out_dim * b_pad
                          + sum(int(p.size) for p in packed))

    out_t = pl.pallas_call(
        _mlp_kernel,
        out_shape=jax.ShapeDtypeStruct((out_dim, b_pad), jnp.float32),
        grid=grid,
        in_specs=in_specs,
        out_specs=out_specs,
        compiler_params=pltpu.CompilerParams(
            dimension_semantics=("parallel",),
            # <= v7x's 64 MiB physical VMEM; plenty for the (Hp, TB) activation
            # + double-buffered (lane-dense) x/out tiles at the default TB.
            vmem_limit_bytes=48 * 1024 * 1024),
        cost_estimate=pl.CostEstimate(
            flops=flops, transcendentals=0, bytes_accessed=bytes_accessed),
    )(x_t, *packed)

    # Back to PyTorch [B, out_dim]; fused inside this jit.
    return out_t[:, :batch].T


def baarle_net_forward(x, packed_params, *, block_b=8192):
    """x: [B, 2] float32.  packed_params: result of pack_params(params)."""
    return _forward_impl(x, tuple(packed_params), block_b=block_b)


def init_baarle_net_params(key, hidden_layers=(64,), in_dim=2, out_dim=2):
    """PyTorch nn.Linear default init: weight [out,in], bias [out]
    ~ U(-1/sqrt(in_features), 1/sqrt(in_features))."""
    dims = [in_dim] + list(hidden_layers) + [out_dim]
    params = []
    for i in range(len(dims) - 1):
        fan_in, fan_out = dims[i], dims[i + 1]
        key, kw, kb = jax.random.split(key, 3)
        bound = 1.0 / math.sqrt(fan_in)
        w = jax.random.uniform(kw, (fan_out, fan_in), jnp.float32, -bound, bound)
        b = jax.random.uniform(kb, (fan_out,), jnp.float32, -bound, bound)
        params.append((w, b))
    return params


def baarle_net_ref(x, params):
    """Pure-JAX reference of the PyTorch forward (y = x @ W.T + b, ReLU between)."""
    h = x
    for i, (w, b) in enumerate(params):
        h = h @ w.T + b
        if i != len(params) - 1:
            h = jnp.maximum(h, 0.0)
    return h


if __name__ == "__main__":
    def run_case(key, hidden_layers, batch):
        kx, kp = jax.random.split(key)
        x = jax.random.normal(kx, (batch, 2), dtype=jnp.float32)
        params = init_baarle_net_params(kp, hidden_layers)
        packed = pack_params(params)                # pack once, reuse per call
        out = jax.block_until_ready(baarle_net_forward(x, packed))
        ref = baarle_net_ref(x, params)
        assert out.shape == (batch, 2), out.shape
        assert jnp.allclose(out, ref, atol=1e-4, rtol=1e-4), float(
            jnp.max(jnp.abs(out - ref)))

    k1, k2 = jax.random.split(jax.random.PRNGKey(0))
    run_case(k1, [64], 8)         # BaarleNet default config, tiny batch
    run_case(k2, [64, 32], 300)   # multiple hidden layers + ragged batch (2 tiles)
    print("KERNEL_OK")
</pallas_src>

<mosaic_0001>
module attributes {stable_mosaic.version = 11 : i64} {
  func.func @_mlp_kernel(%arg0: i32, %arg1: memref<2x128xf32, #tpu.memory_space<vmem>>, %arg2: memref<128x2xf32, #tpu.memory_space<vmem>>, %arg3: memref<128x1xf32, #tpu.memory_space<vmem>>, %arg4: memref<2x128xf32, #tpu.memory_space<vmem>>, %arg5: memref<2x1xf32, #tpu.memory_space<vmem>>, %arg6: memref<2x128xf32, #tpu.memory_space<vmem>>) attributes {dimension_semantics = [#tpu.dimension_semantics<parallel>], iteration_bounds = array<i64: 1>, scalar_prefetch = 0 : i64, scratch_operands = 0 : i64, tpu.core_type = #tpu.core_type<tc>, window_params = [{transform_indices = @transform_0, window_bounds = array<i64: 2, 128>}, {pipeline_mode = #tpu.pipeline_mode<synchronous>, transform_indices = @transform_1, window_bounds = array<i64: 128, 2>}, {pipeline_mode = #tpu.pipeline_mode<synchronous>, transform_indices = @transform_2, window_bounds = array<i64: 128, 1>}, {pipeline_mode = #tpu.pipeline_mode<synchronous>, transform_indices = @transform_3, window_bounds = array<i64: 2, 128>}, {pipeline_mode = #tpu.pipeline_mode<synchronous>, transform_indices = @transform_4, window_bounds = array<i64: 2, 1>}, {transform_indices = @transform_5, window_bounds = array<i64: 2, 128>}]} {
    %c0 = arith.constant 0 : index
    %c0_0 = arith.constant 0 : index
    %0 = vector.load %arg1[%c0, %c0_0] : memref<2x128xf32, #tpu.memory_space<vmem>>, vector<2x128xf32>
    %c0_1 = arith.constant 0 : index
    %c0_2 = arith.constant 0 : index
    %1 = vector.load %arg2[%c0_1, %c0_2] : memref<128x2xf32, #tpu.memory_space<vmem>>, vector<128x2xf32>
    %c0_3 = arith.constant 0 : index
    %c0_4 = arith.constant 0 : index
    %2 = vector.load %arg3[%c0_3, %c0_4] : memref<128x1xf32, #tpu.memory_space<vmem>>, vector<128x1xf32>
    %3 = vector.extract_strided_slice %1 {offsets = [0, 0], sizes = [128, 1], strides = [1, 1]} : vector<128x2xf32> to vector<128x1xf32>
    %4 = vector.extract_strided_slice %0 {offsets = [0, 0], sizes = [1, 128], strides = [1, 1]} : vector<2x128xf32> to vector<1x128xf32>
    %5 = vector.broadcast %3 : vector<128x1xf32> to vector<128x128xf32>
    %6 = vector.broadcast %4 : vector<1x128xf32> to vector<128x128xf32>
    %7 = arith.mulf %5, %6 : vector<128x128xf32>
    %8 = vector.broadcast %2 : vector<128x1xf32> to vector<128x128xf32>
    %9 = arith.addf %8, %7 : vector<128x128xf32>
    %10 = vector.extract_strided_slice %1 {offsets = [0, 1], sizes = [128, 1], strides = [1, 1]} : vector<128x2xf32> to vector<128x1xf32>
    %11 = vector.extract_strided_slice %0 {offsets = [1, 0], sizes = [1, 128], strides = [1, 1]} : vector<2x128xf32> to vector<1x128xf32>
    %12 = vector.broadcast %10 : vector<128x1xf32> to vector<128x128xf32>
    %13 = vector.broadcast %11 : vector<1x128xf32> to vector<128x128xf32>
    %14 = arith.mulf %12, %13 : vector<128x128xf32>
    %15 = arith.addf %9, %14 : vector<128x128xf32>
    %cst = arith.constant 0.000000e+00 : f32
    %16 = vector.broadcast %cst : f32 to vector<128x128xf32>
    %17 = arith.maximumf %15, %16 : vector<128x128xf32>
    %c0_5 = arith.constant 0 : index
    %c0_6 = arith.constant 0 : index
    %18 = vector.load %arg4[%c0_5, %c0_6] : memref<2x128xf32, #tpu.memory_space<vmem>>, vector<2x128xf32>
    %c0_7 = arith.constant 0 : index
    %c0_8 = arith.constant 0 : index
    %19 = vector.load %arg5[%c0_7, %c0_8] : memref<2x1xf32, #tpu.memory_space<vmem>>, vector<2x1xf32>
    %cst_9 = arith.constant dense<0.000000e+00> : vector<2x128xf32>
    %20 = tpu.matmul %18, %17, %cst_9 {dimension_numbers = #tpu.dot_dimension_numbers<[1], [0], [0], [1], [0, 0, 1, 1], [], []>} : vector<2x128xf32>, vector<128x128xf32>, vector<2x128xf32> -> vector<2x128xf32>
    %21 = vector.broadcast %19 : vector<2x1xf32> to vector<2x128xf32>
    %22 = arith.addf %20, %21 : vector<2x128xf32>
    %c0_10 = arith.constant 0 : index
    %c0_11 = arith.constant 0 : index
    %23 = vector.load %arg6[%c0_10, %c0_11] : memref<2x128xf32, #tpu.memory_space<vmem>>, vector<2x128xf32>
    tpu.vector_store %arg6[%c0_10, %c0_11], %22 {strides = array<i32>} : memref<2x128xf32, #tpu.memory_space<vmem>>, vector<2x128xf32>,
    return
  }
  func.func @transform_0(%arg0: i32) -> (i32, i32) {
    %c0_i32 = arith.constant 0 : i32
    %c0_i32_0 = arith.constant 0 : i32
    return %c0_i32, %arg0 : i32, i32
  }
  func.func @transform_1(%arg0: i32) -> (i32, i32) {
    %c0_i32 = arith.constant 0 : i32
    %c0_i32_0 = arith.constant 0 : i32
    %c0_i32_1 = arith.constant 0 : i32
    return %c0_i32, %c0_i32_0 : i32, i32
  }
  func.func @transform_2(%arg0: i32) -> (i32, i32) {
    %c0_i32 = arith.constant 0 : i32
    %c0_i32_0 = arith.constant 0 : i32
    %c0_i32_1 = arith.constant 0 : i32
    return %c0_i32, %c0_i32_0 : i32, i32
  }
  func.func @transform_3(%arg0: i32) -> (i32, i32) {
    %c0_i32 = arith.constant 0 : i32
    %c0_i32_0 = arith.constant 0 : i32
    %c0_i32_1 = arith.constant 0 : i32
    return %c0_i32, %c0_i32_0 : i32, i32
  }
  func.func @transform_4(%arg0: i32) -> (i32, i32) {
    %c0_i32 = arith.constant 0 : i32
    %c0_i32_0 = arith.constant 0 : i32
    %c0_i32_1 = arith.constant 0 : i32
    return %c0_i32, %c0_i32_0 : i32, i32
  }
  func.func @transform_5(%arg0: i32) -> (i32, i32) {
    %c0_i32 = arith.constant 0 : i32
    %c0_i32_0 = arith.constant 0 : i32
    return %c0_i32, %arg0 : i32, i32
  }
}

</mosaic_0001>

<bundles_post_ra>
// kernel: _forward_impl.1
= control target key start
LH: loop header
LB: loop body
LE: loop exit
PB: predicated region body
PF: predicated region fallthrough
CT: control target
= control target key end

     0   :  { %v413_v0 = vmov 0   ;;  %v414_v18 = vmov 1   ;;  %s660_s1 = inlined_call_operand.vmem [shape: f32[128,2], index: 1, kind: input, shape index: {}]   ;;  %s661_s2 = inlined_call_operand.vmem [shape: f32[128,1], index: 2, kind: input, shape index: {}]   ;;  %s662_s0 = inlined_call_operand.vmem [shape: f32[2,128], index: 0, kind: input, shape index: {}]   ;;  %s663_s4 = inlined_call_operand.vmem [shape: f32[2,1], index: 4, kind: input, shape index: {}]   ;;  %s664_s3 = inlined_call_operand.vmem [shape: f32[2,128], index: 3, kind: input, shape index: {}]   ;;  %s665_s5 = inlined_call_operand.vmem [shape: f32[2,128], index: 5, kind: output, shape index: {}]  }
   0x1   :  { %395 = vset.pattern.permute.xlu2 %v413_v0  ;;  %394 = vset.pattern.permute.xlu1 %v413_v0  ;;  %v450_v1 = vld [vmem:[%s660_s1 + $0x20] sm:$0xff]  ;;  %v455_v2 = vld [vmem:[%s660_s1 + $0x10] sm:$0xff]  ;;  %v469_v4 = vld [vmem:[%s660_s1 + $0x28] sm:$0xff] }
   0x2   :  { %v460_v3 = vld [vmem:[%s660_s1] sm:$0xff]  ;;  %393 = vset.pattern.permute.xlu0 %v413_v0  ;;  %75 = vperm.xlu2 %395, %v450_v1   ;;  %v24_v5 = vld [vmem:[%s660_s1 + $0x18] sm:$0xff]  ;;  %v477_v6 = vld [vmem:[%s660_s1 + $0x8] sm:$0xff] }
   0x3   :  { %65 = vperm.xlu1 %394, %v455_v2   ;;  %55 = vperm.xlu0 %393, %v460_v3   ;;  %v29_v7 = vld [vmem:[%s660_s1 + $0x40] sm:$0xff]  ;;  %v28_v8 = vld [vmem:[%s660_s1 + $0x38] sm:$0xff]  ;;  %v490_v9 = vld [vmem:[%s660_s1 + $0x30] sm:$0xff] }
   0x4   :  { %v32_v10 = vld [vmem:[%s660_s1 + $0x58] sm:$0xff]  ;;  %v31_v11 = vld [vmem:[%s660_s1 + $0x50] sm:$0xff]  ;;  %v30_v12 = vld [vmem:[%s660_s1 + $0x48] sm:$0xff] }
   0x5   :  { %v35_v13 = vld [vmem:[%s660_s1 + $0x70] sm:$0xff]  ;;  %v34_v14 = vld [vmem:[%s660_s1 + $0x68] sm:$0xff]  ;;  %v33_v15 = vld [vmem:[%s660_s1 + $0x60] sm:$0xff] }
   0x6   :  { %v52_v16 = vld [vmem:[%s661_s2 + $0x78] sm:$0xff]  ;;  %v51_v19 = vld [vmem:[%s661_s2 + $0x70] sm:$0xff]  ;;  %v50_v20 = vld [vmem:[%s661_s2 + $0x68] sm:$0xff] }
   0x7   :  { %v36_v17 = vld [vmem:[%s660_s1 + $0x78] sm:$0xff]  ;;  %v47_v21 = vld [vmem:[%s661_s2 + $0x50] sm:$0xff]  ;;  %v49_v22 = vld [vmem:[%s661_s2 + $0x60] sm:$0xff] }
   0x8   :  { %v42_v23 = vld [vmem:[%s661_s2 + $0x28] sm:$0xff]  ;;  %v48_v24 = vld [vmem:[%s661_s2 + $0x58] sm:$0xff]  ;;  %v45_v26 = vld [vmem:[%s661_s2 + $0x40] sm:$0xff] }
   0x9   :  { %v46_v25 = vld [vmem:[%s661_s2 + $0x48] sm:$0xff]  ;;  %v44_v28 = vld [vmem:[%s661_s2 + $0x38] sm:$0xff]  ;;  %v37_v29 = vld [vmem:[%s661_s2] sm:$0xff] }
   0xa   :  { %80 = vperm.xlu2 %395, %v469_v4   ;;  %v43_v30 = vld [vmem:[%s661_s2 + $0x30] sm:$0xff]  ;;  %v41_v32 = vld [vmem:[%s661_s2 + $0x20] sm:$0xff]  ;;  %v40_v36 = vld [vmem:[%s661_s2 + $0x18] sm:$0xff] }
   0xb   :  { %70 = vperm.xlu1 %394, %v24_v5   ;;  %60 = vperm.xlu0 %393, %v477_v6   ;;  %v39_v40 = vld [vmem:[%s661_s2 + $0x10] sm:$0xff]  ;;  %v38_v44 = vld [vmem:[%s661_s2 + $0x8] sm:$0xff]  ;;  %v20_v51 = vld [vmem:[%s662_s0] sm:$0x3] }
   0xc   :  { %v606_v52 = vperm.slane %v20_v51, 1  ;;  %v608_v53 = vperm.slane %v20_v51, 0 }
  0x12   :  { %95 = vperm.xlu2 %395, %v29_v7  }
  0x13   :  { %90 = vperm.xlu1 %394, %v28_v8   ;;  %85 = vperm.xlu0 %393, %v490_v9  }
  0x1a   :  { %110 = vperm.xlu2 %395, %v32_v10  }
  0x1b   :  { %105 = vperm.xlu1 %394, %v31_v11   ;;  %100 = vperm.xlu0 %393, %v30_v12  }
  0x22   :  { %125 = vperm.xlu2 %395, %v35_v13  }
  0x23   :  { %120 = vperm.xlu1 %394, %v34_v14   ;;  %115 = vperm.xlu0 %393, %v33_v15  }
  0x2a   :  { %396 = vset.pattern.permute.xlu2 %v414_v18 }
  0x2b   :  { %227 = vperm.xlu1 %394, %v52_v16   ;;  %130 = vperm.xlu0 %393, %v36_v17  }
  0x2c   :  { %307 = vperm.xlu2 %396, %v36_v17  }
  0x33   :  { %397 = vset.pattern.permute.xlu1 %v414_v18  ;;  %222 = vperm.xlu0 %393, %v51_v19  }
  0x34   :  { %398 = vset.pattern.permute.xlu2 %v413_v0  ;;  %303 = vperm.xlu1 %397, %v35_v13  }
  0x35   :  { %217 = vperm.xlu2 %398, %v50_v20  }
  0x3b   :  { %202 = vperm.xlu0 %393, %v47_v21  }
  0x3c   :  { %399 = vset.pattern.permute.xlu1 %v413_v0 }
  0x3d   :  { %400 = vset.pattern.permute.xlu2 %v414_v18  ;;  %212 = vperm.xlu1 %399, %v49_v22  }
  0x3e   :  { %295 = vperm.xlu2 %400, %v33_v15  }
  0x43   :  { %177 = vperm.xlu0 %393, %v42_v23  }
  0x45   :  { %207 = vperm.xlu1 %399, %v48_v24  }
  0x46   :  { %291 = vperm.xlu2 %400, %v32_v10  }
  0x4b   :  { %405 = vset.pattern.permute.xlu0 %v414_v18 }
  0x4c   :  { %299 = vperm.xlu0 %405, %v34_v14  }
  0x4d   :  { %401 = vset.pattern.permute.xlu1 %v414_v18 }
  0x4e   :  { %402 = vset.pattern.permute.xlu2 %v413_v0  ;;  %287 = vperm.xlu1 %401, %v31_v11  }
  0x4f   :  { %197 = vperm.xlu2 %402, %v46_v25  }
  0x54   :  { %279 = vperm.xlu0 %405, %v29_v7  }
  0x56   :  { %283 = vperm.xlu1 %401, %v30_v12  }
  0x57   :  { %192 = vperm.xlu2 %402, %v45_v26  }
  0x5c   :  { %259 = vperm.xlu0 %405, %v24_v5   ;;  %v549_v27 = vpop.permute.xlu2 %75 }
  0x5e   :  { %403 = vset.pattern.permute.xlu1 %v413_v0 }
  0x5f   :  { %404 = vset.pattern.permute.xlu2 %v414_v18  ;;  %187 = vperm.xlu1 %403, %v44_v28  }
  0x60   :  { %275 = vperm.xlu2 %404, %v28_v8  }
  0x64   :  { %410 = vset.pattern.permute.xlu0 %v413_v0  ;;  %v563_v31 = vpop.permute.xlu2 %80 }
  0x65   :  { %152 = vperm.xlu0 %410, %v37_v29  }
  0x67   :  { %182 = vperm.xlu1 %403, %v43_v30  }
  0x68   :  { %271 = vperm.xlu2 %404, %v490_v9  }
  0x6c   :  { %v570_v33 = vpop.permute.xlu2 %95 }
  0x6f   :  { %406 = vset.pattern.permute.xlu1 %v414_v18 }
  0x70   :  { %407 = vset.pattern.permute.xlu2 %v413_v0  ;;  %267 = vperm.xlu1 %406, %v469_v4  }
  0x71   :  { %172 = vperm.xlu2 %407, %v41_v32  }
  0x74   :  { %v111_v37 = vpop.permute.xlu2 %110 }
  0x75   :  { %v574_v34 = vpop.permute.xlu1 %65  ;;  %v576_v35 = vpop.permute.xlu0 %55  ;;  %v145_v13 = vmul.f32 %v608_v53, %v111_v37 }
  0x78   :  { %263 = vperm.xlu1 %406, %v450_v1  }
  0x79   :  { %167 = vperm.xlu2 %407, %v40_v36  }
  0x7c   :  { %v126_v41 = vpop.permute.xlu2 %125 }
  0x7d   :  { %v582_v38 = vpop.permute.xlu1 %70  ;;  %v584_v39 = vpop.permute.xlu0 %60  ;;  %v148_v61 = vmul.f32 %v608_v53, %v126_v41 }
  0x80   :  { %408 = vset.pattern.permute.xlu1 %v413_v0 }
  0x81   :  { %162 = vperm.xlu1 %408, %v39_v40   ;;  %409 = vset.pattern.permute.xlu2 %v414_v18  ;;  %v142_v40 = vmul.f32 %v608_v53, %v570_v33 }
  0x82   :  { %255 = vperm.xlu2 %409, %v455_v2  }
  0x85   :  { %v592_v42 = vpop.permute.xlu1 %90  ;;  %v594_v43 = vpop.permute.xlu0 %85 }
  0x86   :  { %v308_v45 = vpop.permute.xlu2 %307 }
  0x87   :  { %v326_v56 = vmul.f32 %v606_v52, %v308_v45 }
  0x89   :  { %157 = vperm.xlu1 %408, %v38_v44  }
  0x8a   :  { %251 = vperm.xlu2 %409, %v477_v6  }
  0x8d   :  { %v106_v46 = vpop.permute.xlu1 %105  ;;  %v101_v47 = vpop.permute.xlu0 %100 }
  0x8e   :  { %v144_v23 = vmul.f32 %v608_v53, %v106_v46  ;;  %v143_v41 = vmul.f32 %v608_v53, %v101_v47  ;;  %v141_v47 = vmul.f32 %v608_v53, %v592_v42  ;;  %v139_v42 = vmul.f32 %v608_v53, %v563_v31 }
  0x8f   :  { %v218_v50 = vpop.permute.xlu2 %217 }
  0x91   :  { %411 = vset.pattern.permute.xlu1 %v414_v18 }
  0x92   :  { %247 = vperm.xlu1 %411, %v460_v3   ;;  %412 = vset.pattern.permute.xlu2 %v413_v0 }
  0x95   :  { %v121_v48 = vpop.permute.xlu1 %120  ;;  %v116_v49 = vpop.permute.xlu0 %115 }
  0x96   :  { %v147_v11 = vmul.f32 %v608_v53, %v121_v48  ;;  %v146_v12 = vmul.f32 %v608_v53, %v116_v49 }
  0x98   :  { %v296_v59 = vpop.permute.xlu2 %295  ;;  %v243_v17 = vadd.f32 %v218_v50, %v147_v11 }
  0x99   :  { %v323_v14 = vmul.f32 %v606_v52, %v296_v59 }
  0x9d   :  { %v228_v54 = vpop.permute.xlu1 %227  ;;  %v131_v55 = vpop.permute.xlu0 %130 }
  0x9e   :  { %v149_v57 = vmul.f32 %v608_v53, %v131_v55 }
  0xa0   :  { %v245_v58 = vadd.f32 %v228_v54, %v149_v57  ;;  %v292_v4 = vpop.permute.xlu2 %291 }
  0xa1   :  { %v322_v18 = vmul.f32 %v606_v52, %v292_v4 }
  0xa2   :  { %v342_v60 = vadd.f32 %v326_v56, %v245_v58 }
  0xa4   :  { %v358_v62 = vmax.f32 %v342_v60, 0.0 }
  0xa5   :  { %v223_v63 = vpop.permute.xlu0 %222 }
  0xa6   :  { %v244_v0 = vadd.f32 %v223_v63, %v148_v61  ;;  %v304_v1 = vpop.permute.xlu1 %303  ;;  %366 = vmatpush.msra.mxu0 %v358_v62 }
  0xa7   :  { %v325_v2 = vmul.f32 %v606_v52, %v304_v1 }
  0xa9   :  { %v341_v3 = vadd.f32 %v325_v2, %v244_v0  ;;  %v198_v8 = vpop.permute.xlu2 %197  ;;  %v140_v0 = vmul.f32 %v608_v53, %v594_v43  ;;  %v137_v43 = vmul.f32 %v608_v53, %v582_v38 }
  0xaa   :  { %v239_v49 = vadd.f32 %v198_v8, %v143_v41 }
  0xab   :  { %v357_v5 = vmax.f32 %v341_v3, 0.0 }
  0xad   :  { %v203_v6 = vpop.permute.xlu0 %202  ;;  %367 = vmatpush.msra.mxu0 %v357_v5 }
  0xae   :  { %v240_v28 = vadd.f32 %v203_v6, %v144_v23 }
  0xaf   :  { %v213_v7 = vpop.permute.xlu1 %212 }
  0xb0   :  { %v242_v15 = vadd.f32 %v213_v7, %v146_v12 }
  0xb1   :  { %v193_v19 = vpop.permute.xlu2 %192 }
  0xb2   :  { %v339_v26 = vadd.f32 %v323_v14, %v242_v15  ;;  %v238_v50 = vadd.f32 %v193_v19, %v142_v40  ;;  %v138_v15 = vmul.f32 %v608_v53, %v549_v27  ;;  %v360_v19 = vld [vmem:[%s663_s4] sm:$0x3]  ;;  %v136_v27 = vmul.f32 %v608_v53, %v574_v34 }
  0xb3   :  { %363 = vperm.xlu2 %412, %v360_v19   ;;  %v134_v34 = vmul.f32 %v608_v53, %v576_v35 }
  0xb4   :  { %v355_v32 = vmax.f32 %v339_v26, 0.0 }
  0xb5   :  { %v178_v9 = vpop.permute.xlu0 %177 }
  0xb6   :  { %v235_v8 = vadd.f32 %v178_v9, %v139_v42 }
  0xb7   :  { %v208_v10 = vpop.permute.xlu1 %207 }
  0xb8   :  { %v241_v20 = vadd.f32 %v208_v10, %v145_v13 }
  0xba   :  { %v338_v30 = vadd.f32 %v322_v18, %v241_v20  ;;  %v276_v44 = vpop.permute.xlu2 %275 }
  0xbb   :  { %v318_v58 = vmul.f32 %v606_v52, %v276_v44 }
  0xbc   :  { %v354_v46 = vmax.f32 %v338_v30, 0.0 }
  0xbe   :  { %v300_v16 = vpop.permute.xlu0 %299 }
  0xbf   :  { %v324_v21 = vmul.f32 %v606_v52, %v300_v16 }
  0xc0   :  { %v288_v22 = vpop.permute.xlu1 %287 }
  0xc1   :  { %v321_v24 = vmul.f32 %v606_v52, %v288_v22  ;;  %v340_v25 = vadd.f32 %v324_v21, %v243_v17 }
  0xc2   :  { %v272_v59 = vpop.permute.xlu2 %271 }
  0xc3   :  { %v356_v29 = vmax.f32 %v340_v25, 0.0  ;;  %v337_v36 = vadd.f32 %v321_v24, %v240_v28  ;;  %v317_v1 = vmul.f32 %v606_v52, %v272_v59 }
  0xc5   :  { %368 = vmatpush.msra.mxu0 %v356_v29  ;;  %v353_v54 = vmax.f32 %v337_v36, 0.0 }
  0xc6   :  { %v280_v37 = vpop.permute.xlu0 %279 }
  0xc7   :  { %v319_v45 = vmul.f32 %v606_v52, %v280_v37  ;;  %369 = vmatpush.msra.mxu0 %v355_v32  ;;  %v135_v32 = vmul.f32 %v608_v53, %v584_v39  ;;  %v359_v39 = vld [vmem:[%s664_s3] sm:$0x3] }
  0xc8   :  { %v284_v48 = vpop.permute.xlu1 %283 }
  0xc9   :  { %v320_v51 = vmul.f32 %v606_v52, %v284_v48  ;;  %370 = vmatpush.msra.mxu0 %v354_v46  ;;  %v335_v56 = vadd.f32 %v319_v45, %v238_v50 }
  0xcb   :  { %371 = vmatpush.msra.mxu0 %v353_v54  ;;  %v336_v55 = vadd.f32 %v320_v51, %v239_v49  ;;  %v351_v33 = vmax.f32 %v335_v56, 0.0  ;;  %v173_v4 = vpop.permute.xlu2 %172 }
  0xcc   :  { %v234_v31 = vadd.f32 %v173_v4, %v138_v15 }
  0xcd   :  { %v352_v57 = vmax.f32 %v336_v55, 0.0 }
  0xce   :  { %v260_v14 = vpop.permute.xlu0 %259 }
  0xcf   :  { %372 = vmatpush.msra.mxu0 %v352_v57  ;;  %v314_v16 = vmul.f32 %v606_v52, %v260_v14 }
  0xd1   :  { %v188_v60 = vpop.permute.xlu1 %187  ;;  %373 = vmatpush.msra.mxu0 %v351_v33 }
  0xd2   :  { %v237_v61 = vadd.f32 %v188_v60, %v141_v47 }
  0xd3   :  { %v168_v11 = vpop.permute.xlu2 %167 }
  0xd4   :  { %v334_v62 = vadd.f32 %v318_v58, %v237_v61  ;;  %v233_v17 = vadd.f32 %v168_v11, %v137_v43 }
  0xd6   :  { %v350_v63 = vmax.f32 %v334_v62, 0.0  ;;  %v330_v38 = vadd.f32 %v314_v16, %v233_v17 }
  0xd7   :  { %v153_v45 = vpop.permute.xlu0 %152 }
  0xd8   :  { %374 = vmatpush.msra.mxu0 %v350_v63  ;;  %v346_v23 = vmax.f32 %v330_v38, 0.0  ;;  %v230_v48 = vadd.f32 %v153_v45, %v134_v34 }
  0xd9   :  { %v183_v2 = vpop.permute.xlu1 %182 }
  0xda   :  { %v236_v3 = vadd.f32 %v183_v2, %v140_v0 }
  0xdc   :  { %v333_v5 = vadd.f32 %v317_v1, %v236_v3  ;;  %v256_v21 = vpop.permute.xlu2 %255 }
  0xdd   :  { %v313_v24 = vmul.f32 %v606_v52, %v256_v21 }
  0xde   :  { %v349_v6 = vmax.f32 %v333_v5, 0.0 }
  0xe0   :  { %375 = vmatpush.msra.mxu0 %v349_v6 }
  0xe2   :  { %v268_v7 = vpop.permute.xlu1 %267 }
  0xe3   :  { %v316_v10 = vmul.f32 %v606_v52, %v268_v7 }
  0xe4   :  { %v252_v29 = vpop.permute.xlu2 %251 }
  0xe5   :  { %v332_v12 = vadd.f32 %v316_v10, %v235_v8  ;;  %v312_v36 = vmul.f32 %v606_v52, %v252_v29 }
  0xe7   :  { %v348_v13 = vmax.f32 %v332_v12, 0.0 }
  0xe9   :  { %376 = vmatpush.msra.mxu0 %v348_v13 }
  0xea   :  { %v264_v18 = vpop.permute.xlu1 %263 }
  0xeb   :  { %v315_v9 = vmul.f32 %v606_v52, %v264_v18 }
  0xed   :  { %v331_v20 = vadd.f32 %v315_v9, %v234_v31 }
  0xef   :  { %v347_v22 = vmax.f32 %v331_v20, 0.0 }
  0xf1   :  { %377 = vmatpush.msra.mxu0 %v347_v22 }
  0xf3   :  { %v163_v25 = vpop.permute.xlu1 %162  ;;  %378 = vmatpush.msra.mxu0 %v346_v23 }
  0xf4   :  { %v232_v26 = vadd.f32 %v163_v25, %v136_v27 }
  0xf6   :  { %v329_v28 = vadd.f32 %v313_v24, %v232_v26 }
  0xf8   :  { %v345_v30 = vmax.f32 %v329_v28, 0.0 }
  0xfa   :  { %379 = vmatpush.msra.mxu0 %v345_v30 }
  0xfb   :  { %v158_v37 = vpop.permute.xlu1 %157 }
  0xfc   :  { %v231_v40 = vadd.f32 %v158_v37, %v135_v32 }
  0xfe   :  { %v328_v41 = vadd.f32 %v312_v36, %v231_v40 }
 0x100   :  { %v344_v44 = vmax.f32 %v328_v41, 0.0 }
 0x102   :  { %380 = vmatpush.msra.mxu0 %v344_v44 }
 0x104   :  { %v248_v46 = vpop.permute.xlu1 %247 }
 0x105   :  { %v311_v49 = vmul.f32 %v606_v52, %v248_v46 }
 0x107   :  { %v327_v50 = vadd.f32 %v311_v49, %v230_v48 }
 0x109   :  { %v343_v51 = vmax.f32 %v327_v50, 0.0 }
 0x10b   :  { %381 = vmatpush.msra.mxu0 %v343_v51 }
 0x10c   :  { %382 = vmatmul.f32.vlgmr.msra.gmra.mxu0 %v359_v39 }
 0x10d   :  { %v364_v54 = vpop.permute.xlu2 %363 }
 0x189   :  { %v383_v55 = vpop.f32.mrf.mxu0 }
 0x18a   :  { %v384_v56 = vadd.f32 %v383_v55, %v364_v54 }
 0x18c   :  { %386 = vst [vmem:[%s665_s5] sm:$0x3] %v384_v56 }

</bundles_post_ra>
